<compile_context>
chip_gen: v7x
topology: tpu7x:2x2x1
jax: 0.10.0
libtpu: 0.0.40
codegen_flags: <defaults>
</compile_context>

<pallas_src>
import functools

import jax
import jax.numpy as jnp
from jax.experimental import pallas as pl
from jax.experimental.pallas import tpu as pltpu

LANE = 128


def _round_up(x, m):
    return ((x + m - 1) // m) * m


def generator_kernel(x_ref, w1_ref, w2_ref, w3_ref, bias_ref, o_ref, *,
                     hidden_dim, out_pad):
    # Packed biases (f32): row 0 -> b1, row 1 -> b2, row 2 -> b3 (lane-padded).
    b1 = bias_ref[0:1, :hidden_dim]
    b2 = bias_ref[1:2, :hidden_dim]
    b3 = bias_ref[2:3, :out_pad]

    compute_dtype = w1_ref.dtype

    # Input tile arrives f32 from HBM; cast to bf16 in a (otherwise idle)
    # VPU slot for the MXU.
    x = x_ref[...].astype(compute_dtype)

    # Layer 1: Linear(input_dim -> hidden_dim) + Tanh (f32 accum / f32 tanh).
    h1 = jnp.tanh(
        jnp.dot(x, w1_ref[...], preferred_element_type=jnp.float32) + b1)
    h1 = h1.astype(compute_dtype)

    # Layer 2: Linear(hidden_dim -> hidden_dim) + Tanh.
    h2 = jnp.tanh(
        jnp.dot(h1, w2_ref[...], preferred_element_type=jnp.float32) + b2)
    h2 = h2.astype(compute_dtype)

    # Layer 3: Linear(hidden_dim -> output_dim), lane-padded to 128 columns
    # so the store is an unmasked full-width vst.
    out = jnp.dot(h2, w3_ref[...], preferred_element_type=jnp.float32) + b3
    o_ref[...] = out.astype(o_ref.dtype)


def prepare_params(params, compute_dtype=jnp.bfloat16):
    """One-time (per param update) prep: pad w3 to 128 lanes, pack biases,
    cast weights to the MXU compute dtype. Keep the result cached and reuse
    it for every generator_forward call."""
    w1, b1 = params["w1"], params["b1"]
    w2, b2 = params["w2"], params["b2"]
    w3, b3 = params["w3"], params["b3"]

    H = w1.shape[1]
    O = w3.shape[1]
    O_pad = _round_up(O, LANE)          # lane-dense output width (>=128)
    W = max(H, O_pad)                   # packed-bias width

    # Lane-dense padding of the last layer (exact: extra columns are zero and
    # sliced off in the wrapper).
    w3p = jnp.zeros((H, O_pad), w3.dtype).at[:, :O].set(w3)

    # Pack biases into one small f32 buffer: (3, W).
    bias = jnp.zeros((3, W), jnp.float32)
    bias = bias.at[0, :H].set(b1.reshape(-1).astype(jnp.float32))
    bias = bias.at[1, :H].set(b2.reshape(-1).astype(jnp.float32))
    bias = bias.at[2, :O].set(b3.reshape(-1).astype(jnp.float32))

    return {
        "w1": w1.astype(compute_dtype),
        "w2": w2.astype(compute_dtype),
        "w3": w3p.astype(compute_dtype),
        "bias": bias,
    }


@functools.partial(jax.jit, static_argnames=("output_dim", "block_m_cap"))
def generator_forward(noise, w1c, w2c, w3c, bias, *, output_dim,
                      block_m_cap=1024):
    """3-layer MLP generator, fully fused in one Pallas kernel.

    noise: (B, input_dim) float32 (passed raw; cast happens inside the kernel)
    w1c/w2c/w3c/bias: outputs of prepare_params()
    """
    B, D = noise.shape
    H = w1c.shape[1]
    O_pad = w3c.shape[1]
    W = bias.shape[1]

    # Batch tiling: target a 2-step grid so v7x's two TensorCores both run
    # (dimension_semantics=("parallel",)); on v5e/v6e the extra step costs
    # ~0.35 us. Cap the tile so VMEM stays tiny regardless of batch size.
    bm = min(block_m_cap, max(8, _round_up(pl.cdiv(B, 2), 8)))
    grid = (pl.cdiv(B, bm),)

    in_specs = [
        pl.BlockSpec((bm, D), lambda i: (i, 0)),       # x tile (f32)
        pl.BlockSpec((D, H), lambda i: (0, 0)),        # w1 (replicated)
        pl.BlockSpec((H, H), lambda i: (0, 0)),        # w2 (replicated)
        pl.BlockSpec((H, O_pad), lambda i: (0, 0)),    # w3 padded (replicated)
        pl.BlockSpec((3, W), lambda i: (0, 0)),        # packed biases
    ]
    out_spec = pl.BlockSpec((bm, O_pad), lambda i: (i, 0))

    cost = pl.CostEstimate(
        flops=2 * B * (D * H + H * H + H * O_pad),
        transcendentals=2 * B * H,
        bytes_accessed=(noise.size * 4
                        + w1c.size * 2 + w2c.size * 2 + w3c.size * 2
                        + bias.size * 4
                        + B * O_pad * 4),
    )

    out = pl.pallas_call(
        functools.partial(generator_kernel, hidden_dim=H, out_pad=O_pad),
        out_shape=jax.ShapeDtypeStruct((B, O_pad), jnp.float32),
        grid=grid,
        in_specs=in_specs,
        out_specs=out_spec,
        cost_estimate=cost,
        compiler_params=pltpu.CompilerParams(
            dimension_semantics=("parallel",)),
    )(noise, w1c, w2c, w3c, bias)

    # Only the slice of the padded output is materialized downstream.
    return out[:, :output_dim]


def init_params(key, input_dim=256, hidden_dim=128, output_dim=2,
                dtype=jnp.float32):
    """PyTorch nn.Linear-style init: U(-1/sqrt(fan_in), 1/sqrt(fan_in))."""
    def linear(k, fan_in, fan_out):
        kw, kb = jax.random.split(k)
        bound = 1.0 / jnp.sqrt(fan_in)
        w = jax.random.uniform(kw, (fan_in, fan_out), dtype, -bound, bound)
        b = jax.random.uniform(kb, (1, fan_out), dtype, -bound, bound)
        return w, b

    k1, k2, k3 = jax.random.split(key, 3)
    w1, b1 = linear(k1, input_dim, hidden_dim)
    w2, b2 = linear(k2, hidden_dim, hidden_dim)
    w3, b3 = linear(k3, hidden_dim, output_dim)
    return {"w1": w1, "b1": b1, "w2": w2, "b2": b2, "w3": w3, "b3": b3}


def reference_forward_f32(noise, params):
    h1 = jnp.tanh(noise @ params["w1"] + params["b1"])
    h2 = jnp.tanh(h1 @ params["w2"] + params["b2"])
    return h2 @ params["w3"] + params["b3"]


def reference_forward_mixed(noise, params, compute_dtype=jnp.bfloat16):
    """Mirrors the kernel's bf16-operand / f32-accum precision strategy."""
    x = noise.astype(compute_dtype)
    w1 = params["w1"].astype(compute_dtype)
    w2 = params["w2"].astype(compute_dtype)
    w3 = params["w3"].astype(compute_dtype)
    h1 = jnp.tanh(
        jnp.dot(x, w1, preferred_element_type=jnp.float32)
        + params["b1"].astype(jnp.float32))
    h1 = h1.astype(compute_dtype)
    h2 = jnp.tanh(
        jnp.dot(h1, w2, preferred_element_type=jnp.float32)
        + params["b2"].astype(jnp.float32))
    h2 = h2.astype(compute_dtype)
    return (jnp.dot(h2, w3, preferred_element_type=jnp.float32)
            + params["b3"].astype(jnp.float32))


if __name__ == "__main__":
    key = jax.random.PRNGKey(0)
    k_params, k_noise = jax.random.split(key)

    input_dim, hidden_dim, output_dim = 256, 128, 2
    batch = 64  # 2 grid steps at bm=32 (exercises both v7x TCs)

    params = init_params(k_params, input_dim, hidden_dim, output_dim)
    prepped = prepare_params(params)  # one-time weight prep, reused below
    noise = jax.random.normal(k_noise, (batch, input_dim), dtype=jnp.float32)

    out = generator_forward(noise, prepped["w1"], prepped["w2"],
                            prepped["w3"], prepped["bias"],
                            output_dim=output_dim)
    out = jax.block_until_ready(out)
    assert out.shape == (batch, output_dim)

    ref_mixed = reference_forward_mixed(noise, params)
    ref_f32 = reference_forward_f32(noise, params)
    assert jnp.allclose(out, ref_mixed, atol=1e-3, rtol=1e-3), "mixed-prec mismatch"
    assert jnp.allclose(out, ref_f32, atol=5e-2, rtol=5e-2), "f32 semantics mismatch"

    # Also exercise a batch with a partial last block (no explicit padding).
    noise_odd = noise[:37]
    out_odd = jax.block_until_ready(
        generator_forward(noise_odd, prepped["w1"], prepped["w2"],
                          prepped["w3"], prepped["bias"],
                          output_dim=output_dim))
    assert out_odd.shape == (37, output_dim)
    assert jnp.allclose(out_odd, ref_mixed[:37], atol=1e-3, rtol=1e-3)

    print("KERNEL_OK")
</pallas_src>

<mosaic_0001>
module attributes {stable_mosaic.version = 11 : i64} {
  func.func @generator_kernel(%arg0: i32, %arg1: memref<32x256xf32, #tpu.memory_space<vmem>>, %arg2: memref<256x128xbf16, #tpu.memory_space<vmem>>, %arg3: memref<128x128xbf16, #tpu.memory_space<vmem>>, %arg4: memref<128x128xbf16, #tpu.memory_space<vmem>>, %arg5: memref<3x128xf32, #tpu.memory_space<vmem>>, %arg6: memref<32x128xf32, #tpu.memory_space<vmem>>) attributes {dimension_semantics = [#tpu.dimension_semantics<parallel>], iteration_bounds = array<i64: 2>, scalar_prefetch = 0 : i64, scratch_operands = 0 : i64, tpu.core_type = #tpu.core_type<tc>, window_params = [{transform_indices = @transform_0, window_bounds = array<i64: 32, 256>}, {pipeline_mode = #tpu.pipeline_mode<synchronous>, transform_indices = @transform_1, window_bounds = array<i64: 256, 128>}, {pipeline_mode = #tpu.pipeline_mode<synchronous>, transform_indices = @transform_2, window_bounds = array<i64: 128, 128>}, {pipeline_mode = #tpu.pipeline_mode<synchronous>, transform_indices = @transform_3, window_bounds = array<i64: 128, 128>}, {pipeline_mode = #tpu.pipeline_mode<synchronous>, transform_indices = @transform_4, window_bounds = array<i64: 3, 128>}, {transform_indices = @transform_5, window_bounds = array<i64: 32, 128>}]} {
    %c0 = arith.constant 0 : index
    %c0_0 = arith.constant 0 : index
    %0 = vector.load %arg5[%c0, %c0_0] : memref<3x128xf32, #tpu.memory_space<vmem>>, vector<1x128xf32>
    %c1 = arith.constant 1 : index
    %c0_1 = arith.constant 0 : index
    %1 = vector.load %arg5[%c1, %c0_1] : memref<3x128xf32, #tpu.memory_space<vmem>>, vector<1x128xf32>
    %c2 = arith.constant 2 : index
    %c0_2 = arith.constant 0 : index
    %2 = vector.load %arg5[%c2, %c0_2] : memref<3x128xf32, #tpu.memory_space<vmem>>, vector<1x128xf32>
    %c0_3 = arith.constant 0 : index
    %c0_4 = arith.constant 0 : index
    %3 = vector.load %arg1[%c0_3, %c0_4] : memref<32x256xf32, #tpu.memory_space<vmem>>, vector<32x256xf32>
    %4 = arith.truncf %3 : vector<32x256xf32> to vector<32x256xbf16>
    %c0_5 = arith.constant 0 : index
    %c0_6 = arith.constant 0 : index
    %5 = vector.load %arg2[%c0_5, %c0_6] : memref<256x128xbf16, #tpu.memory_space<vmem>>, vector<256x128xbf16>
    %cst = arith.constant dense<0.000000e+00> : vector<32x128xf32>
    %6 = tpu.matmul %4, %5, %cst {dimension_numbers = #tpu.dot_dimension_numbers<[1], [0], [0], [1], [0, 0, 1, 1], [], []>} : vector<32x256xbf16>, vector<256x128xbf16>, vector<32x128xf32> -> vector<32x128xf32>
    %7 = vector.broadcast %0 : vector<1x128xf32> to vector<32x128xf32>
    %8 = arith.addf %6, %7 : vector<32x128xf32>
    %9 = math.tanh %8 : vector<32x128xf32>
    %10 = arith.truncf %9 : vector<32x128xf32> to vector<32x128xbf16>
    %c0_7 = arith.constant 0 : index
    %c0_8 = arith.constant 0 : index
    %11 = vector.load %arg3[%c0_7, %c0_8] : memref<128x128xbf16, #tpu.memory_space<vmem>>, vector<128x128xbf16>
    %cst_9 = arith.constant dense<0.000000e+00> : vector<32x128xf32>
    %12 = tpu.matmul %10, %11, %cst_9 {dimension_numbers = #tpu.dot_dimension_numbers<[1], [0], [0], [1], [0, 0, 1, 1], [], []>} : vector<32x128xbf16>, vector<128x128xbf16>, vector<32x128xf32> -> vector<32x128xf32>
    %13 = vector.broadcast %1 : vector<1x128xf32> to vector<32x128xf32>
    %14 = arith.addf %12, %13 : vector<32x128xf32>
    %15 = math.tanh %14 : vector<32x128xf32>
    %16 = arith.truncf %15 : vector<32x128xf32> to vector<32x128xbf16>
    %c0_10 = arith.constant 0 : index
    %c0_11 = arith.constant 0 : index
    %17 = vector.load %arg4[%c0_10, %c0_11] : memref<128x128xbf16, #tpu.memory_space<vmem>>, vector<128x128xbf16>
    %cst_12 = arith.constant dense<0.000000e+00> : vector<32x128xf32>
    %18 = tpu.matmul %16, %17, %cst_12 {dimension_numbers = #tpu.dot_dimension_numbers<[1], [0], [0], [1], [0, 0, 1, 1], [], []>} : vector<32x128xbf16>, vector<128x128xbf16>, vector<32x128xf32> -> vector<32x128xf32>
    %19 = vector.broadcast %2 : vector<1x128xf32> to vector<32x128xf32>
    %20 = arith.addf %18, %19 : vector<32x128xf32>
    %c0_13 = arith.constant 0 : index
    %c0_14 = arith.constant 0 : index
    %21 = vector.load %arg6[%c0_13, %c0_14] : memref<32x128xf32, #tpu.memory_space<vmem>>, vector<32x128xf32>
    tpu.vector_store %arg6[%c0_13, %c0_14], %20 {strides = array<i32>} : memref<32x128xf32, #tpu.memory_space<vmem>>, vector<32x128xf32>,
    return
  }
  func.func @transform_0(%arg0: i32) -> (i32, i32) {
    %c0_i32 = arith.constant 0 : i32
    %c0_i32_0 = arith.constant 0 : i32
    return %arg0, %c0_i32 : i32, i32
  }
  func.func @transform_1(%arg0: i32) -> (i32, i32) {
    %c0_i32 = arith.constant 0 : i32
    %c0_i32_0 = arith.constant 0 : i32
    %c0_i32_1 = arith.constant 0 : i32
    return %c0_i32, %c0_i32_0 : i32, i32
  }
  func.func @transform_2(%arg0: i32) -> (i32, i32) {
    %c0_i32 = arith.constant 0 : i32
    %c0_i32_0 = arith.constant 0 : i32
    %c0_i32_1 = arith.constant 0 : i32
    return %c0_i32, %c0_i32_0 : i32, i32
  }
  func.func @transform_3(%arg0: i32) -> (i32, i32) {
    %c0_i32 = arith.constant 0 : i32
    %c0_i32_0 = arith.constant 0 : i32
    %c0_i32_1 = arith.constant 0 : i32
    return %c0_i32, %c0_i32_0 : i32, i32
  }
  func.func @transform_4(%arg0: i32) -> (i32, i32) {
    %c0_i32 = arith.constant 0 : i32
    %c0_i32_0 = arith.constant 0 : i32
    %c0_i32_1 = arith.constant 0 : i32
    return %c0_i32, %c0_i32_0 : i32, i32
  }
  func.func @transform_5(%arg0: i32) -> (i32, i32) {
    %c0_i32 = arith.constant 0 : i32
    %c0_i32_0 = arith.constant 0 : i32
    return %arg0, %c0_i32 : i32, i32
  }
}

</mosaic_0001>

<bundles_post_ra>
// kernel: generator_forward.1
= control target key start
LH: loop header
LB: loop body
LE: loop exit
PB: predicated region body
PF: predicated region fallthrough
CT: control target
= control target key end

     0   :  { %10 = vsyncpa [#allocation3], 0  ;;  %s1536_s0 = inlined_call_operand.hbm [shape: f32[64,256], index: 0, kind: input, shape index: {}]   ;;  %s1537_s1 = inlined_call_operand.hbm [shape: bf16[256,128], index: 1, kind: input, shape index: {}]   ;;  %s1538_s2 = inlined_call_operand.hbm [shape: bf16[128,128], index: 2, kind: input, shape index: {}]   ;;  %s1539_s3 = inlined_call_operand.hbm [shape: bf16[128,128], index: 3, kind: input, shape index: {}]   ;;  %s1540_s4 = inlined_call_operand.vmem [shape: f32[3,128], index: 4, kind: input, shape index: {}]   ;;  %s1541_s5 = inlined_call_operand.vmem [shape: f32[64,128], index: 5, kind: output, shape index: {}]  }
   0x1   :  { %12 = vsyncpa [#allocation3 + $0x1], 0 }
   0x2   :  { %13 = vsyncpa [#allocation5], 0 }
   0x3   :  { %14 = vsyncpa [#allocation8], 0  ;;  %s1298_s18 = smov 0   ;;  %s1300_s19 = smov 0  }
   0x4   :  { %s1302_s20 = smov 0   ;;  %s1304_s21 = smov 0  }
   0x5 LB: > { %s835_s22 = sadd.s32 4294967295, %s1258_s21   ;;  %p40_p0 = scmp.ne.s32.totalorder %s1250_s19, %s1246_s18  ;;  %s1258_s21 = sphi %s1304_s21, %s1558_s21   ;;  %s1254_s20 = sphi %s1302_s20, %s1557_s20   ;;  %s1250_s19 = sphi %s1300_s19, %s1556_s19   ;;  %s1246_s18 = sphi %s1298_s18, %s1555_s18  }
   0x6   : > { %p1320_p1 = scmp.eq.s32.totalorder %s835_s22, 0  ;;  %p837_p2 = scmp.ge.s32.totalorder %s1258_s21, 1 }
   0x7   : > { %p161_p3 = scmp.lt.s32.totalorder %s1258_s21, 3  ;;  %s1260_s26 = smov [#allocation4]  }
   0x8   : > { %s1546_s23 = scalar_select %p1320_p1, 1, 0 }
   0x9   : > { %p1328_p4 = por %p1320_p1, %p40_p0  ;;  %p1332_p5 = pnand %p837_p2, %p161_p3 }
   0xa   : > { %s173_s27 = sshll.u32 %s1260_s26, 4  ;;  %s1261_s29 = smov [#allocation6]   ;;  %s1336_s27 = int_to_ptr.vmem [resolvable:$true] %s173_s27 }
   0xb   : > { %s1547_s24 = scalar_select %p1328_p4, 1, 0 }
   0xc   : > { %s1548_s25 = scalar_select %p1332_p5, 1, 0 }
   0xd   : > { %p994_p6 = pneg %p1332_p5  ;;  %s186_s30 = sshll.u32 %s1261_s29, 4  ;;  %s1346_s30 = int_to_ptr.vmem [resolvable:$true] %s186_s30 }
   0xe   : > { %s1262_s6 = smov [#allocation7]   ;;  %s1102_s10 = scalar_lea.hbm %s1537_s1, 2048 }
   0xf   : > { %p1342_p7 = pnand %p994_p6, %p1320_p1  ;;  %s1348_s7 = sshll.u32 %s1262_s6, 4  ;;  %s200_s7 = int_to_ptr.vmem [resolvable:$true] %s1348_s7 }
  0x10   : > { %p1103_p8 = scmp.ne.s32.totalorder %s1537_s1, %s1102_s10  ;;  %p1109_p12 = scmp.lt.u32.totalorder %s1102_s10, %s1537_s1 }
  0x11   : > { %p1358_p9 = pneg %p1342_p7 }
  0x13   : > { %p1105_p10 = pnand %p1358_p9, %p1103_p8 }
  0x15   : > { %p1106_p11 = pneg %p1105_p10 }
  0x17   : > { %p1111_p13 = pnand %p1109_p12, %p1106_p11 }
  0x19   : > { %1114 = shalt.err (!%p1111_p13)
}
  0x1a   : > { %s1115_s16 = scalar_lea.vmem %s1336_s27, 2048  ;;  %p1123_p6 = scmp.lt.s32.totalorder %s1336_s27, %s1336_s27 }
  0x1b   : > { %p1116_p0 = scmp.ne.s32.totalorder %s1336_s27, %s1115_s16  ;;  %p1124_p1 = scmp.lt.s32.totalorder %s1115_s16, %s1115_s16 }
  0x1d   : > { %p1118_p2 = pnand %p1116_p0, %p1358_p9  ;;  %p1125_p8 = por %p1124_p1, %p1123_p6 }
  0x1f   : > { %p1119_p3 = pneg %p1118_p2 }
  0x21   : > { %p1126_p10 = pnand %p1125_p8, %p1119_p3 }
  0x23   : > { %1129 = shalt.err (!%p1126_p10)
}
  0x24   : > { %s1263_s17 = smov 64   ;;  %s1264_s18 = smov 4  }
  0x25   : > { %997 = dma.hbm_to_vmem [thread:$0]  (!%p1342_p7), %s1537_s1, 2048, %s1336_s27, [#allocation5], %s1263_s17, %s1263_s17, %s1264_s18  }
  0x26   : > { %s1130_s9 = scalar_lea.hbm %s1538_s2, 1024 }
  0x27   : > { %p1131_p1 = scmp.ne.s32.totalorder %s1538_s2, %s1130_s9  ;;  %p1137_p13 = scmp.lt.u32.totalorder %s1130_s9, %s1538_s2 }
  0x29   : > { %p1133_p11 = pnand %p1131_p1, %p1358_p9 }
  0x2b   : > { %p1134_p12 = pneg %p1133_p11 }
  0x2d   : > { %p1139_p0 = pnand %p1137_p13, %p1134_p12 }
  0x2f   : > { %1142 = shalt.err (!%p1139_p0)
}
  0x30   : > { %s1143_s27 = scalar_lea.vmem %s1346_s30, 1024  ;;  %p1151_p8 = scmp.lt.s32.totalorder %s1346_s30, %s1346_s30 }
  0x31   : > { %p1144_p2 = scmp.ne.s32.totalorder %s1346_s30, %s1143_s27  ;;  %p1152_p10 = scmp.lt.s32.totalorder %s1143_s27, %s1143_s27 }
  0x33   : > { %p1146_p3 = pnand %p1144_p2, %p1358_p9  ;;  %p1153_p1 = por %p1152_p10, %p1151_p8 }
  0x35   : > { %p1147_p6 = pneg %p1146_p3 }
  0x37   : > { %p1154_p11 = pnand %p1153_p1, %p1147_p6 }
  0x39   : > { %1157 = shalt.err (!%p1154_p11)
}
  0x3a   : > { %1000 = dma.hbm_to_vmem [thread:$0]  (!%p1342_p7), %s1538_s2, 1024, %s1346_s30, [#allocation5], %s1263_s17, %s1263_s17, %s1264_s18  }
  0x3b   : > { %s1158_s6 = scalar_lea.hbm %s1539_s3, 1024 }
  0x3c   : > { %p1159_p12 = scmp.ne.s32.totalorder %s1539_s3, %s1158_s6  ;;  %p1165_p2 = scmp.lt.u32.totalorder %s1158_s6, %s1539_s3 }
  0x3e   : > { %p1161_p13 = pnand %p1159_p12, %p1358_p9 }
  0x40   : > { %p1162_p0 = pneg %p1161_p13 }
  0x42   : > { %p1167_p3 = pnand %p1165_p2, %p1162_p0 }
  0x44   : > { %1170 = shalt.err (!%p1167_p3)
}
  0x45   : > { %s1171_s12 = scalar_lea.vmem %s200_s7, 1024  ;;  %p1179_p1 = scmp.lt.s32.totalorder %s200_s7, %s200_s7 }
  0x46   : > { %p1172_p6 = scmp.ne.s32.totalorder %s200_s7, %s1171_s12  ;;  %p1180_p11 = scmp.lt.s32.totalorder %s1171_s12, %s1171_s12 }
  0x48   : > { %p1174_p8 = pnand %p1172_p6, %p1358_p9  ;;  %p1181_p4 = por %p1180_p11, %p1179_p1 }
  0x4a   : > { %p1175_p10 = pneg %p1174_p8 }
  0x4c   : > { %p1182_p5 = pnand %p1181_p4, %p1175_p10 }
  0x4e   : > { %1185 = shalt.err (!%p1182_p5)
}
  0x4f   : > { %1003 = dma.hbm_to_vmem [thread:$0]  (!%p1342_p7), %s1539_s3, 1024, %s200_s7, [#allocation8], %s1263_s17, %s1263_s17, %s1264_s18  }
  0x50   : > { %s1431_s13 = sadd.s32 1, %s1258_s21   ;;  %s27_s27 = sadd.s32 1, %s1254_s20 }
  0x51   : > { %s24_s28 = ssub.s32 %s1258_s21, %s1431_s13  ;;  %p34_p5 = scmp.ne.s32.totalorder %s1254_s20, %s1250_s19 }
  0x52   : > { %p25_p4 = scmp.eq.s32.totalorder %s24_s28, 0  ;;  %p35_p9 = scmp.eq.s32.totalorder %s1258_s21, 0 }
  0x53   : > { %p1011_p12 = scmp.lt.s32.totalorder %s1258_s21, 2  ;;  %s216_s16 = sand.u32 1, %s1254_s20  }
  0x54   : > { %s1441_s15 = scalar_select %p25_p4, %s1254_s20, %s27_s27  }
  0x55   : > { %p36_p13 = por %p35_p9, %p34_p5  ;;  %s842_s26 = sshll.u32 %s216_s16, 6 }
  0x56   : > { %s891_s29 = sshll.u32 %s1258_s21, 10  ;;  %s220_s7 = scalar_lea.vmem [#allocation2], %s842_s26 }
  0x57   : > { %s1448_s9 = scalar_lea.hbm %s1536_s0, %s891_s29  ;;  %s228_s17 = sshll.u32 %s220_s7, 4  ;;  %s1450_s17 = int_to_ptr.vmem [resolvable:$true] %s228_s17 }
  0x58   : > { %p1452_p7 = pnand %p1011_p12, %p36_p13  ;;  %s1456_s10 = scalar_lea.sflag [#allocation3], %s216_s16 }
  0x59   : > { %s1186_s11 = scalar_lea.hbm %s1448_s9, 1024  ;;  %s1191_s14 = scalar_lea.hbm %s1536_s0, 2048 }
  0x5a   : > { %p1187_p0 = scmp.ne.s32.totalorder %s1448_s9, %s1186_s11  ;;  %p1188_p2 = pneg %p1452_p7 }
  0x5b   : > { %p1192_p8 = scmp.lt.u32.totalorder %s1448_s9, %s1536_s0  ;;  %p1193_p10 = scmp.lt.u32.totalorder %s1191_s14, %s1186_s11 }
  0x5c   : > { %p1189_p3 = pnand %p1188_p2, %p1187_p0  ;;  %p1195_p11 = scmp.lt.u32.totalorder %s1186_s11, %s1448_s9 }
  0x5d   : > { %p1194_p1 = por %p1193_p10, %p1192_p8 }
  0x5e   : > { %p1190_p6 = pneg %p1189_p3 }
  0x5f   : > { %p1196_p4 = por %p1195_p11, %p1194_p1 }
  0x61   : > { %p1197_p5 = pnand %p1196_p4, %p1190_p6 }
  0x63   : > { %1200 = shalt.err (!%p1197_p5)
}
  0x64   : > { %s1201_s16 = scalar_lea.vmem %s1450_s17, 1024  ;;  %s1265_s26 = smov [#allocation2]  }
  0x65   : > { %p1202_p9 = scmp.ne.s32.totalorder %s1450_s17, %s1201_s16  ;;  %s1206_s29 = sshll.u32 %s1265_s26, 4  ;;  %s1207_s29 = int_to_ptr.vmem [resolvable:$false] %s1206_s29 }
  0x66   : > { %s1208_s6 = scalar_lea.vmem %s1207_s29, 2048  ;;  %p1209_p0 = scmp.lt.s32.totalorder %s1450_s17, %s1207_s29 }
  0x67   : > { %p1204_p12 = pnand %p1202_p9, %p1188_p2  ;;  %p1210_p3 = scmp.lt.s32.totalorder %s1208_s6, %s1201_s16 }
  0x69   : > { %p1205_p13 = pneg %p1204_p12  ;;  %p1211_p8 = por %p1210_p3, %p1209_p0 }
  0x6b   : > { %p1212_p10 = pnand %p1211_p8, %p1205_p13 }
  0x6d   : > { %1215 = shalt.err (!%p1212_p10)
}
  0x6e   : > { %s1266_s8 = smov 256   ;;  %s1267_s7 = smov 16  }
  0x6f   : > { %1007 = dma.hbm_to_vmem [thread:$0]  (!%p1452_p7), %s1448_s9, 1024, %s1450_s17, %s1456_s10, %s1266_s8, %s1266_s8, %s1267_s7  }
  0x70   : > { %p1552_p2 = scmp.ne.s32.totalorder %s1548_s25, 0 }
  0x71   : > { %s242_s11 = sand.u32 (!%p1552_p2), 1, %s1250_s19   ;;  %p1553_p6 = scmp.ne.s32.totalorder (!%p1552_p2), %s1547_s24, 0 }
  0x72   : > { %240 = sbr.rel (%p1552_p2) target bundleno = 849 (0x351), region = 40  ;;  %s847_s12 = sshll.u32 (!%p1552_p2), %s242_s11, 6 }
  0x73   : > { %s243_s30 = scalar_lea.sflag (!%p1552_p2), [#allocation3], %s242_s11  ;;  %s1487_s14 = scalar_lea.vmem (!%p1552_p2), [#allocation2], %s847_s12 }
  0x79   : > { %1233 = dma.done.wait (%p1553_p6), %s243_s30, 1024  }
  0x7a   : > { %1235 = vsyncadd (%p1553_p6), %s243_s30, 4294966272  ;;  %p1554_p1 = scmp.ne.s32.totalorder %s1546_s23, 0 }
  0x7c   : > { %1237 = dma.done.wait (%p1554_p1), [#allocation5], 3072  }
  0x7d   : > { %1239 = vsyncadd (%p1554_p1), [#allocation5], 4294964224 }
  0x7e   : > { %1241 = dma.done.wait (%p1554_p1), [#allocation8], 1024  }
  0x7f   : > { %1243 = vsyncadd (%p1554_p1), [#allocation8], 4294966272  ;;  %v1054_v0 = vld [vmem:[#allocation4 + $0x40] sm:$0xff]   ;;  %v1056_v2 = vld [vmem:[#allocation4 + $0x48] sm:$0xff]   ;;  %s851_s17 = sshll.u32 %s835_s22, 2 }
  0x80   : > { %v1055_v1 = vld [vmem:[#allocation4] sm:$0xff]   ;;  %892 = vmatprep.subr.bf16.mxu0 %v1054_v0  ;;  %v1057_v3 = vld [vmem:[#allocation4 + $0x8] sm:$0xff]   ;;  %v1058_v4 = vld [vmem:[#allocation4 + $0x50] sm:$0xff]   ;;  %p287_p7 = scmp.lt.s32.totalorder %s851_s17, 7 }
  0x81   : > { %893 = vmatpush3.bf16.msra.mxu0 %v1055_v1  ;;  %v1059_v5 = vld [vmem:[#allocation4 + $0x10] sm:$0xff]   ;;  %v1060_v6 = vld [vmem:[#allocation4 + $0x58] sm:$0xff]   ;;  %v1062_v8 = vld [vmem:[#allocation4 + $0x60] sm:$0xff]  }
  0x82   : > { %894 = vmatprep.subr.bf16.mxu0 %v1056_v2  ;;  %v1061_v7 = vld [vmem:[#allocation4 + $0x18] sm:$0xff]   ;;  %v1063_v9 = vld [vmem:[#allocation4 + $0x20] sm:$0xff]   ;;  %v1064_v10 = vld [vmem:[#allocation4 + $0x68] sm:$0xff]   ;;  %s1560_s17 = smov (!%p287_p7, %s851_s17), 7 }
  0x83   : > { %v297_v11 = vld [vmem:[%s1487_s14 + $0x8] sm:$0xff]  ;;  %v299_v12 = vld [vmem:[%s1487_s14 + $0x18] sm:$0xff]  ;;  %v1066_v15 = vld [vmem:[#allocation4 + $0x70] sm:$0xff]   ;;  %s852_s18 = sshll.u32 %s1560_s17, 3 }
  0x84   : > { %v305_v13 = vpack.c.bf16 %v299_v12, %v297_v11  ;;  %v1065_v14 = vld [vmem:[#allocation4 + $0x28] sm:$0xff]   ;;  %v1070_v16 = vld [vmem:[#allocation6] sm:$0xff]   ;;  %v1067_v17 = vld [vmem:[#allocation4 + $0x30] sm:$0xff]   ;;  %s290_s26 = scalar_lea.vmem %s1541_s5, %s852_s18 }
  0x85   : > { %895 = vmatpush3.bf16.msra.mxu0 %v1057_v3  ;;  %940 = vmatprep.subr.bf16.mxu1 %v1070_v16  ;;  %v1068_v18 = vld [vmem:[#allocation4 + $0x78] sm:$0xff]   ;;  %v296_v20 = vld [vmem:[%s1487_s14] sm:$0xff]  ;;  %v298_v21 = vld [vmem:[%s1487_s14 + $0x10] sm:$0xff] }
  0x86   : > { %896 = vmatprep.subr.bf16.mxu0 %v1058_v4  ;;  %472 = vmatprep.mubr.bf16.mxu0 %v305_v13  ;;  %v1069_v19 = vld [vmem:[#allocation4 + $0x38] sm:$0xff]   ;;  %v301_v22 = vld [vmem:[%s1487_s14 + $0x28] sm:$0xff]  ;;  %v304_v24 = vpack.c.bf16 %v298_v21, %v296_v20  ;;  %v300_v26 = vld [vmem:[%s1487_s14 + $0x20] sm:$0xff] }
  0x87   : > { %941 = vmatpush3.bf16.msra.mxu1 %v1070_v16  ;;  %v303_v23 = vld [vmem:[%s1487_s14 + $0x38] sm:$0xff]  ;;  %v302_v27 = vld [vmem:[%s1487_s14 + $0x30] sm:$0xff]  ;;  %v1071_v29 = vld [vmem:[#allocation6 + $0x8] sm:$0xff]  }
  0x88   : > { %v307_v25 = vpack.c.bf16 %v303_v23, %v301_v22  ;;  %v306_v28 = vpack.c.bf16 %v302_v27, %v300_v26  ;;  %942 = vmatprep.subr.bf16.mxu1 %v1071_v29  ;;  %v1072_v30 = vld [vmem:[#allocation6 + $0x10] sm:$0xff]   ;;  %v1073_v31 = vld [vmem:[#allocation6 + $0x18] sm:$0xff]   ;;  %v1074_v32 = vld [vmem:[#allocation6 + $0x20] sm:$0xff]  }
  0x89   : > { %897 = vmatpush3.bf16.msra.mxu0 %v1059_v5  ;;  %v1075_v33 = vld [vmem:[#allocation6 + $0x28] sm:$0xff]   ;;  %v1076_v34 = vld [vmem:[#allocation6 + $0x30] sm:$0xff]   ;;  %v1077_v35 = vld [vmem:[#allocation6 + $0x38] sm:$0xff]  }
  0x8a   : > { %898 = vmatprep.subr.bf16.mxu0 %v1060_v6  ;;  %v1078_v36 = vld [vmem:[#allocation7] sm:$0xff]   ;;  %v1079_v37 = vld [vmem:[#allocation7 + $0x8] sm:$0xff]   ;;  %v1080_v38 = vld [vmem:[#allocation7 + $0x10] sm:$0xff]  }
  0x8b   : > { %943 = vmatpush3.bf16.msra.mxu1 %v1071_v29  ;;  %v853_v40 = vld [vmem:[%s1540_s4] ss:$0 sm:$0xff]  ;;  %v1081_v62 = vld [vmem:[#allocation7 + $0x18] sm:$0xff]   ;;  %v1083_v0 = vld [vmem:[#allocation7 + $0x28] sm:$0xff]  }
  0x8c   : > { %944 = vmatprep.subr.bf16.mxu1 %v1072_v30  ;;  %v1082_v63 = vld [vmem:[#allocation7 + $0x20] sm:$0xff]   ;;  %v1084_v1 = vld [vmem:[#allocation7 + $0x30] sm:$0xff]   ;;  %v1085_v2 = vld [vmem:[#allocation7 + $0x38] sm:$0xff]  }
  0x8d   : > { %899 = vmatpush3.bf16.msra.mxu0 %v1061_v7  ;;  %v870_v3 = vld [vmem:[%s1540_s4 + $0x1] ss:$0 sm:$0xff] }
  0x8e   : > { %900 = vmatprep.subr.bf16.mxu0 %v1062_v8 }
  0x8f   : > { %945 = vmatpush3.bf16.msra.mxu1 %v1072_v30 }
  0x90   : > { %946 = vmatprep.subr.bf16.mxu1 %v1073_v31 }
  0x91   : > { %901 = vmatpush3.bf16.msra.mxu0 %v1063_v9 }
  0x92   : > { %902 = vmatprep.subr.bf16.mxu0 %v1064_v10 }
  0x93   : > { %947 = vmatpush3.bf16.msra.mxu1 %v1073_v31 }
  0x94   : > { %948 = vmatprep.subr.bf16.mxu1 %v1074_v32 }
  0x95   : > { %903 = vmatpush3.bf16.msra.mxu0 %v1065_v14 }
  0x96   : > { %904 = vmatprep.subr.bf16.mxu0 %v1066_v15 }
  0x97   : > { %949 = vmatpush3.bf16.msra.mxu1 %v1074_v32 }
  0x98   : > { %950 = vmatprep.subr.bf16.mxu1 %v1075_v33 }
  0x99   : > { %905 = vmatpush3.bf16.msra.mxu0 %v1067_v17 }
  0x9a   : > { %906 = vmatprep.subr.bf16.mxu0 %v1068_v18  ;;  %v879_v18 = vld [vmem:[%s1540_s4 + $0x2] ss:$0 sm:$0xff] }
  0x9b   : > { %951 = vmatpush3.bf16.msra.mxu1 %v1075_v33 }
  0x9c   : > { %952 = vmatprep.subr.bf16.mxu1 %v1076_v34 }
  0x9d   : > { %907 = vmatpush3.bf16.msra.mxu0 %v1069_v19 }
  0x9e   : > { %960 = vmatprep.subr.bf16.mxu0 %v1078_v36 }
  0x9f   : > { %953 = vmatpush3.bf16.msra.mxu1 %v1076_v34 }
  0xa0   : > { %473 = vmatmul.mubr.bf16.vlgmr.msra.gmra.mrb[0].mxu0 %v304_v24  ;;  %954 = vmatprep.subr.bf16.mxu1 %v1077_v35 }
  0xa1   : > { %480 = vmatprep.mubr.bf16.mxu0 %v307_v25  ;;  %961 = vmatpush3.bf16.msra.mxu0 %v1078_v36 }
  0xa2   : > { %962 = vmatprep.subr.bf16.mxu0 %v1079_v37 }
  0xa3   : > { %955 = vmatpush3.bf16.msra.mxu1 %v1077_v35 }
  0xa5   : > { %963 = vmatpush3.bf16.msra.mxu0 %v1079_v37 }
  0xa6   : > { %964 = vmatprep.subr.bf16.mxu0 %v1080_v38 }
  0xa8   : > { %481 = vmatmul.mubr.bf16.gmra.mrb[4].mxu0 %v306_v28 }
  0xa9   : > { %965 = vmatpush3.bf16.msra.mxu0 %v1080_v38 }
  0xaa   : > { %966 = vmatprep.subr.bf16.mxu0 %v1081_v62 }
  0xad   : > { %967 = vmatpush3.bf16.msra.mxu0 %v1081_v62 }
  0xae   : > { %968 = vmatprep.subr.bf16.mxu0 %v1082_v63 }
  0xb1   : > { %969 = vmatpush3.bf16.msra.mxu0 %v1082_v63 }
  0xb2   : > { %970 = vmatprep.subr.bf16.mxu0 %v1083_v0 }
  0xb5   : > { %971 = vmatpush3.bf16.msra.mxu0 %v1083_v0 }
  0xb6   : > { %972 = vmatprep.subr.bf16.mxu0 %v1084_v1 }
  0xb9   : > { %973 = vmatpush3.bf16.msra.mxu0 %v1084_v1 }
  0xba   : > { %974 = vmatprep.subr.bf16.mxu0 %v1085_v2 }
  0xbd   : > { %975 = vmatpush3.bf16.msra.mxu0 %v1085_v2 }
 0x173   : > { %v908_v39 = vpop.f32.mrb[0].mxu0 }
 0x174   : > { %v909_v41 = vpop.f32.mrb[1].mxu0 }
 0x175   : > { %v910_v42 = vadd.f32 %v909_v41, %v908_v39  ;;  %v911_v43 = vpop.f32.mrb[2].mxu0 }
 0x176   : > { %v912_v44 = vpop.f32.mrb[3].mxu0 }
 0x177   : > { %v475_v45 = vadd.f32 %v910_v42, %v853_v40  ;;  %v913_v46 = vadd.f32 %v912_v44, %v911_v43 }
 0x179   : > { %v478_v47 = vadd.f32 %v913_v46, %v853_v40  ;;  %1086 = vtanh.f32 %v475_v45 }
 0x17b   : > { %1088 = vtanh.f32 %v478_v47  ;;  %v914_v48 = vpop.f32.mrb[4].mxu0 }
 0x17c   : > { %v915_v49 = vpop.f32.mrb[5].mxu0 }
 0x17d   : > { %v916_v50 = vadd.f32 %v915_v49, %v914_v48  ;;  %v917_v51 = vpop.f32.mrb[6].mxu0 }
 0x17e   : > { %v918_v52 = vpop.f32.mrb[7].mxu0 }
 0x17f   : > { %v483_v53 = vadd.f32 %v916_v50, %v853_v40  ;;  %v919_v54 = vadd.f32 %v918_v52, %v917_v51 }
 0x181   : > { %v486_v55 = vadd.f32 %v919_v54, %v853_v40  ;;  %1090 = vtanh.f32 %v483_v53 }
 0x183   : > { %1092 = vtanh.f32 %v486_v55  ;;  %v1087_v56 = vpop.eup %1086 }
 0x185   : > { %v1089_v57 = vpop.eup %1088 }
 0x186   : > { %v493_v58 = vpack.c.bf16 %v1089_v57, %v1087_v56 }
 0x188   : > { %956 = vmatprep.mubr.bf16.mxu1 %v493_v58 }
 0x18b   : > { %v1091_v59 = vpop.eup %1090 }
 0x18d   : > { %v1093_v60 = vpop.eup %1092 }
 0x18e   : > { %v494_v61 = vpack.c.bf16 %v1093_v60, %v1091_v59 }
 0x190   : > { %957 = vmatmul.mubr.bf16.vlgmr.msra.gmra.mrb[0].mxu1 %v494_v61 }
 0x263   : > { %v958_v4 = vpop.f32.mrb[0].mxu1 }
 0x264   : > { %v606_v5 = vadd.f32 %v958_v4, %v870_v3  ;;  %v597_v6 = vpop.f32.mrb[1].mxu1 }
 0x265   : > { %v598_v7 = vadd.f32 %v870_v3, %v597_v6  ;;  %v959_v8 = vpop.f32.mrb[2].mxu1 }
 0x266   : > { %1094 = vtanh.f32 %v606_v5  ;;  %v609_v9 = vadd.f32 %v959_v8, %v870_v3  ;;  %v600_v10 = vpop.f32.mrb[3].mxu1 }
 0x267   : > { %1096 = vtanh.f32 %v598_v7  ;;  %v601_v11 = vadd.f32 %v870_v3, %v600_v10 }
 0x268   : > { %1098 = vtanh.f32 %v609_v9 }
 0x269   : > { %1100 = vtanh.f32 %v601_v11 }
 0x270   : > { %v1095_v12 = vpop.eup %1094 }
 0x271   : > { %v1097_v13 = vpop.eup %1096 }
 0x272   : > { %v1099_v14 = vpop.eup %1098 }
 0x273   : > { %v1101_v15 = vpop.eup %1100  ;;  %v617_v16 = vpack.c.bf16 %v1099_v14, %v1095_v12 }
 0x274   : > { %v616_v17 = vpack.c.bf16 %v1101_v15, %v1097_v13 }
 0x276   : > { %976 = vmatprep.mubr.bf16.mxu0 %v616_v17 }
 0x277   : > { %977 = vmatmul.mubr.bf16.vlgmr.msra.gmra.mrb[8].mxu0 %v617_v16 }
 0x34a   : > { %v978_v19 = vpop.f32.mrb[8].mxu0 }
 0x34b   : > { %v720_v20 = vpop.f32.mrb[9].mxu0  ;;  %v729_v25 = vadd.f32 %v978_v19, %v879_v18 }
 0x34c   : > { %v721_v21 = vadd.f32 %v879_v18, %v720_v20  ;;  %v979_v22 = vpop.f32.mrb[10].mxu0 }
 0x34d   : > { %v723_v23 = vpop.f32.mrb[11].mxu0  ;;  %v732_v26 = vadd.f32 %v979_v22, %v879_v18  ;;  %737 = vst [vmem:[%s290_s26 + $0x10] sm:$0xff] %v729_v25 }
 0x34e   : > { %735 = vst [vmem:[%s290_s26] sm:$0xff] %v721_v21  ;;  %v724_v24 = vadd.f32 %v879_v18, %v723_v23 }
 0x34f   : > { %738 = vst [vmem:[%s290_s26 + $0x18] sm:$0xff] %v732_v26 }
 0x350   : > { %736 = vst [vmem:[%s290_s26 + $0x8] sm:$0xff] %v724_v24 }
 0x351 PF: > { %p17_p11 = scmp.ge.s32.totalorder %s1431_s13, 4   ;;  %s1555_s18 = smov %s1250_s19 }
 0x352   : > { %s1556_s19 = smov %s1254_s20  ;;  %s1557_s20 = smov %s1441_s15 }
 0x353   : > { %s1558_s21 = smov %s1431_s13  ;;  %19 = sbr.rel (!%p17_p11) target bundleno = 5 (0x5), region = 92 }
 0x35a   :  { %761 = vsyncpa [#allocation3], 1 }
 0x35b   :  { %763 = vsyncpa [#allocation3 + $0x1], 1 }
 0x35c   :  { %764 = vsyncpa [#allocation5], 1 }
 0x35d   :  { %765 = vsyncpa [#allocation8], 1 }

</bundles_post_ra>
